<compile_context>
chip_gen: v5e
topology: v5e:2x2
jax: 0.10.0
libtpu: 0.0.40
codegen_flags: <defaults>
</compile_context>

<pallas_src>
import functools

import jax
import jax.numpy as jnp
from jax.experimental import pallas as pl
from jax.experimental.pallas import tpu as pltpu


def _round_up(x: int, m: int) -> int:
    return ((x + m - 1) // m) * m


def _linear_kernel(x_ref, w_ref, b_ref, o_ref, acc_ref):
    # x_ref: (tm, tk), w_ref: (tk, tn), b_ref: (1, tn), o_ref: (tm, tn)
    k = pl.program_id(2)

    @pl.when(k == 0)
    def _():
        # Seed the accumulator with the broadcast bias: removes the separate
        # zero-fill and the per-tile epilogue bias add.
        acc_ref[...] = jnp.broadcast_to(
            b_ref[...].astype(jnp.float32), acc_ref.shape
        )

    acc_ref[...] += jnp.dot(
        x_ref[...], w_ref[...], preferred_element_type=jnp.float32
    )

    @pl.when(k == pl.num_programs(2) - 1)
    def _():
        # Epilogue is just cast + (lane-dense, unmasked) store.
        o_ref[...] = acc_ref[...].astype(o_ref.dtype)


def _prepare_linear_params(weight, bias, *, tk: int, tn: int):
    """One-time (hoisted) weight transpose + padding into (Kp, Np) layout."""
    out_features, in_features = weight.shape
    kp = _round_up(in_features, tk)
    np_ = _round_up(out_features, tn)

    w_t = weight.T  # (K, OUT): MXU contracts directly, no per-call transpose.
    if (kp, np_) != (in_features, out_features):
        w_t = jnp.pad(w_t, ((0, kp - in_features), (0, np_ - out_features)))

    b = bias.reshape(1, out_features)
    if np_ != out_features:
        b = jnp.pad(b, ((0, 0), (0, np_ - out_features)))
    return w_t, b


@functools.partial(jax.jit, static_argnames=("tm", "tn", "tk", "out_features"))
def _linear_call(x, wp, bp, *, tm: int, tn: int, tk: int, out_features: int):
    m, k_dim = x.shape
    kp, np_ = wp.shape
    mp = _round_up(m, tm)

    # Pad activations only when ragged (skips a full HBM copy when aligned).
    if (mp, kp) != (m, k_dim):
        xp = jnp.pad(x, ((0, mp - m), (0, kp - k_dim)))
    else:
        xp = x

    grid = (mp // tm, np_ // tn, kp // tk)

    in_bytes = xp.dtype.itemsize
    out_bytes = x.dtype.itemsize
    # Double-buffered input/output tiles + resident f32 accumulator, 25%
    # headroom; clamped so it stays valid on v5e/v6e (128 MiB) and v7x (64 MiB).
    budget = int(
        1.25
        * (
            2 * (tm * tk * in_bytes + tk * tn * in_bytes + tn * in_bytes
                 + tm * tn * out_bytes)
            + tm * tn * 4
        )
    )
    vmem_limit = min(max(budget, 32 * 1024 * 1024), 64 * 1024 * 1024)

    cost = pl.CostEstimate(
        flops=2 * m * k_dim * out_features,
        bytes_accessed=(m * k_dim + k_dim * out_features
                        + m * out_features + out_features) * in_bytes,
        transcendentals=0,
    )

    out_padded = pl.pallas_call(
        _linear_kernel,
        out_shape=jax.ShapeDtypeStruct((mp, np_), x.dtype),
        grid_spec=pltpu.PrefetchScalarGridSpec(
            num_scalar_prefetch=0,
            grid=grid,
            in_specs=[
                pl.BlockSpec((tm, tk), lambda i, j, k: (i, k)),   # x tile
                pl.BlockSpec((tk, tn), lambda i, j, k: (k, j)),   # W (K,OUT) tile
                pl.BlockSpec((1, tn), lambda i, j, k: (0, j)),    # bias tile
            ],
            out_specs=pl.BlockSpec((tm, tn), lambda i, j, k: (i, j)),
            scratch_shapes=[pltpu.VMEM((tm, tn), jnp.float32)],
        ),
        compiler_params=pltpu.CompilerParams(
            dimension_semantics=("parallel", "parallel", "arbitrary"),
            vmem_limit_bytes=vmem_limit,
        ),
        cost_estimate=cost,
    )(xp, wp, bp)

    return out_padded[:m, :out_features]


class PallasLinear:
    """Pallas equivalent of nn.Linear: y = x @ W.T + b.

    Weight transpose/padding is done once at construction (inference-style
    caching), not per call.
    """

    def __init__(self, weight, bias):
        self.out_features, self.in_features = weight.shape
        kp = _round_up(self.in_features, 128)
        np_ = _round_up(self.out_features, 128)
        # 512-class tiles (256-aligned for the v6e/v7x MXU), clamped to the
        # padded problem; whole-K single pass whenever K <= 512.
        self._tk = min(kp, 512)
        self._tn = min(np_, 512)
        self._wp, self._bp = _prepare_linear_params(
            weight, bias, tk=self._tk, tn=self._tn
        )

    def __call__(self, x):
        m = x.shape[0]
        mp8 = _round_up(m, 8)
        # GEMV-like (M <= 8): keep tm=8; otherwise 512-class M tiles so both
        # v7x TensorCores get whole output-row blocks for medium/large M.
        tm = mp8 if mp8 <= 512 else 512
        return _linear_call(
            x, self._wp, self._bp,
            tm=tm, tn=self._tn, tk=self._tk,
            out_features=self.out_features,
        )


if __name__ == "__main__":
    key = jax.random.PRNGKey(0)
    kx, kw, kb = jax.random.split(key, 3)

    # Shapes from the PyTorch module: Linear(10, 10), input (5, 10).
    B, IN, OUT = 5, 10, 10

    # Deterministic init mimicking nn.Linear's uniform(-1/sqrt(in), 1/sqrt(in)).
    bound = 1.0 / jnp.sqrt(jnp.float32(IN))
    weight = jax.random.uniform(kw, (OUT, IN), jnp.float32, -bound, bound)
    bias = jax.random.uniform(kb, (OUT,), jnp.float32, -bound, bound)
    x = jax.random.normal(kx, (B, IN), jnp.float32)

    model = PallasLinear(weight, bias)   # weight transpose/pad hoisted here
    out = model(x)
    out = jax.block_until_ready(out)

    # Reference check against plain JAX (PyTorch nn.Linear semantics).
    ref = x @ weight.T + bias
    assert out.shape == (B, OUT)
    assert jnp.allclose(out, ref, atol=1e-5, rtol=1e-5)

    print("KERNEL_OK")
</pallas_src>

<mosaic_0001>
module attributes {stable_mosaic.version = 11 : i64} {
  func.func @_linear_kernel(%arg0: i32, %arg1: i32, %arg2: i32, %arg3: memref<8x128xf32, #tpu.memory_space<vmem>>, %arg4: memref<128x128xf32, #tpu.memory_space<vmem>>, %arg5: memref<1x128xf32, #tpu.memory_space<vmem>>, %arg6: memref<8x128xf32, #tpu.memory_space<vmem>>, %arg7: memref<8x128xf32, #tpu.memory_space<vmem>>) attributes {dimension_semantics = [#tpu.dimension_semantics<parallel>, #tpu.dimension_semantics<parallel>, #tpu.dimension_semantics<arbitrary>], iteration_bounds = array<i64: 1, 1, 1>, scalar_prefetch = 0 : i64, scratch_operands = 1 : i64, tpu.core_type = #tpu.core_type<tc>, window_params = [{transform_indices = @transform_0, window_bounds = array<i64: 8, 128>}, {transform_indices = @transform_1, window_bounds = array<i64: 128, 128>}, {transform_indices = @transform_2, window_bounds = array<i64: 1, 128>}, {transform_indices = @transform_3, window_bounds = array<i64: 8, 128>}]} {
    %c0_i32 = arith.constant 0 : i32
    %0 = arith.cmpi eq, %arg2, %c0_i32 : i32
    %1 = arith.extui %0 : i1 to i32
    %c0_i32_0 = arith.constant 0 : i32
    %2 = arith.cmpi ne, %1, %c0_i32_0 : i32
    scf.if %2 {
      %c0_10 = arith.constant 0 : index
      %c0_11 = arith.constant 0 : index
      %12 = vector.load %arg5[%c0_10, %c0_11] : memref<1x128xf32, #tpu.memory_space<vmem>>, vector<1x128xf32>
      %13 = vector.shape_cast %12 : vector<1x128xf32> to vector<1x128xf32>
      %14 = vector.broadcast %13 : vector<1x128xf32> to vector<8x128xf32>
      %c0_12 = arith.constant 0 : index
      %c0_13 = arith.constant 0 : index
      %15 = vector.load %arg7[%c0_12, %c0_13] : memref<8x128xf32, #tpu.memory_space<vmem>>, vector<8x128xf32>
      tpu.vector_store %arg7[%c0_12, %c0_13], %14 {strides = array<i32>} : memref<8x128xf32, #tpu.memory_space<vmem>>, vector<8x128xf32>,
    } else {
    }
    %c0 = arith.constant 0 : index
    %c0_1 = arith.constant 0 : index
    %3 = vector.load %arg7[%c0, %c0_1] : memref<8x128xf32, #tpu.memory_space<vmem>>, vector<8x128xf32>
    %c0_2 = arith.constant 0 : index
    %c0_3 = arith.constant 0 : index
    %4 = vector.load %arg3[%c0_2, %c0_3] : memref<8x128xf32, #tpu.memory_space<vmem>>, vector<8x128xf32>
    %c0_4 = arith.constant 0 : index
    %c0_5 = arith.constant 0 : index
    %5 = vector.load %arg4[%c0_4, %c0_5] : memref<128x128xf32, #tpu.memory_space<vmem>>, vector<128x128xf32>
    %cst = arith.constant dense<0.000000e+00> : vector<8x128xf32>
    %6 = tpu.matmul %4, %5, %cst {dimension_numbers = #tpu.dot_dimension_numbers<[1], [0], [0], [1], [0, 0, 1, 1], [], []>} : vector<8x128xf32>, vector<128x128xf32>, vector<8x128xf32> -> vector<8x128xf32>
    %7 = arith.addf %3, %6 : vector<8x128xf32>
    %c0_6 = arith.constant 0 : index
    %c0_7 = arith.constant 0 : index
    %8 = vector.load %arg7[%c0_6, %c0_7] : memref<8x128xf32, #tpu.memory_space<vmem>>, vector<8x128xf32>
    tpu.vector_store %arg7[%c0_6, %c0_7], %7 {strides = array<i32>} : memref<8x128xf32, #tpu.memory_space<vmem>>, vector<8x128xf32>,
    %c0_i32_8 = arith.constant 0 : i32
    %9 = arith.cmpi eq, %arg2, %c0_i32_8 : i32
    %10 = arith.extui %9 : i1 to i32
    %c0_i32_9 = arith.constant 0 : i32
    %11 = arith.cmpi ne, %10, %c0_i32_9 : i32
    scf.if %11 {
      %c0_10 = arith.constant 0 : index
      %c0_11 = arith.constant 0 : index
      %12 = vector.load %arg7[%c0_10, %c0_11] : memref<8x128xf32, #tpu.memory_space<vmem>>, vector<8x128xf32>
      %c0_12 = arith.constant 0 : index
      %c0_13 = arith.constant 0 : index
      %13 = vector.load %arg6[%c0_12, %c0_13] : memref<8x128xf32, #tpu.memory_space<vmem>>, vector<8x128xf32>
      tpu.vector_store %arg6[%c0_12, %c0_13], %12 {strides = array<i32>} : memref<8x128xf32, #tpu.memory_space<vmem>>, vector<8x128xf32>,
    } else {
    }
    return
  }
  func.func @transform_0(%arg0: i32, %arg1: i32, %arg2: i32) -> (i32, i32) {
    %c0_i32 = arith.constant 0 : i32
    return %arg0, %arg2 : i32, i32
  }
  func.func @transform_1(%arg0: i32, %arg1: i32, %arg2: i32) -> (i32, i32) {
    %c0_i32 = arith.constant 0 : i32
    return %arg2, %arg1 : i32, i32
  }
  func.func @transform_2(%arg0: i32, %arg1: i32, %arg2: i32) -> (i32, i32) {
    %c0_i32 = arith.constant 0 : i32
    %c0_i32_0 = arith.constant 0 : i32
    return %c0_i32, %arg1 : i32, i32
  }
  func.func @transform_3(%arg0: i32, %arg1: i32, %arg2: i32) -> (i32, i32) {
    %c0_i32 = arith.constant 0 : i32
    return %arg0, %arg1 : i32, i32
  }
}

</mosaic_0001>

<bundles_post_ra>
// kernel: _linear_call.1
= control target key start
LH: loop header
LB: loop body
LE: loop exit
PB: predicated region body
PF: predicated region fallthrough
CT: control target
= control target key end

     0   :  { %8 = vsyncpa [#allocation4], 0  ;;  %s195_s0 = inlined_call_operand.vmem [shape: f32[8,128], index: 0, kind: input, shape index: {}]   ;;  %s196_s1 = inlined_call_operand.hbm [shape: f32[128,128], index: 1, kind: input, shape index: {}]   ;;  %s197_s2 = inlined_call_operand.vmem [shape: f32[1,128], index: 2, kind: input, shape index: {}]   ;;  %s198_s3 = inlined_call_operand.hbm [shape: f32[8,128], index: 3, kind: output, shape index: {}]  }
   0x1   :  { %9 = vsyncpa [#allocation5], 0  ;;  %s16_s14 = sshll.u32 %s196_s1, 4  ;;  %s159_s15 = smov [#allocation3]   ;;  %s17_s14 = int_to_ptr.hbm [resolvable:$true] %s16_s14 }
   0x2   :  { %s18_s16 = sshll.u32 %s159_s15, 4  ;;  %s160_s17 = smov 128   ;;  %s19_s16 = int_to_ptr.vmem [resolvable:$true] %s18_s16 }
   0x3   :  { %s161_s18 = smov 8  }
   0x4   :  { %24 = dma.hbm_to_vmem [thread:$0]  %s17_s14, 2048, %s19_s16, [#allocation4], %s160_s17, %s160_s17, %s161_s18  }
   0x5   :  { %155 = dma.done.wait [#allocation4], 2048  }
   0x6   :  { %156 = vsyncadd [#allocation4], 4294965248  ;;  %v57_v0 = vld [vmem:[#allocation3 + $0x78] sm:$0xff]  ;;  %v56_v1 = vld [vmem:[#allocation3 + $0x70] sm:$0xff]  ;;  %s162_s22 = smov [#allocation6]   ;;  %s92_s26 = sshll.u32 %s198_s3, 4  ;;  %s93_s26 = int_to_ptr.hbm [resolvable:$true] %s92_s26 }
   0x7   :  { %58 = vmatpush.msra.mxu0 %v57_v0  ;;  %v55_v2 = vld [vmem:[#allocation3 + $0x68] sm:$0xff]  ;;  %v54_v3 = vld [vmem:[#allocation3 + $0x60] sm:$0xff]  ;;  %v53_v4 = vld [vmem:[#allocation3 + $0x58] sm:$0xff]  ;;  %s90_s23 = sshll.u32 %s162_s22, 4  ;;  %s91_s23 = int_to_ptr.vmem [resolvable:$true] %s90_s23 }
   0x8   :  { %v52_v5 = vld [vmem:[#allocation3 + $0x50] sm:$0xff]  ;;  %v51_v6 = vld [vmem:[#allocation3 + $0x48] sm:$0xff]  ;;  %v50_v7 = vld [vmem:[#allocation3 + $0x40] sm:$0xff] }
   0x9   :  { %59 = vmatpush.msra.mxu0 %v56_v1  ;;  %v49_v8 = vld [vmem:[#allocation3 + $0x38] sm:$0xff]  ;;  %v48_v9 = vld [vmem:[#allocation3 + $0x30] sm:$0xff]  ;;  %v47_v10 = vld [vmem:[#allocation3 + $0x28] sm:$0xff] }
   0xa   :  { %v46_v11 = vld [vmem:[#allocation3 + $0x20] sm:$0xff]  ;;  %v45_v12 = vld [vmem:[#allocation3 + $0x18] sm:$0xff]  ;;  %v44_v13 = vld [vmem:[#allocation3 + $0x10] sm:$0xff] }
   0xb   :  { %60 = vmatpush.msra.mxu0 %v55_v2  ;;  %v43_v14 = vld [vmem:[#allocation3 + $0x8] sm:$0xff]  ;;  %v42_v15 = vld [vmem:[#allocation3] sm:$0xff] }
   0xc   :  { %v41_v16 = vld [vmem:[%s195_s0] sm:$0xff] }
   0xd   :  { %61 = vmatpush.msra.mxu0 %v54_v3  ;;  %v106_v17 = vld [vmem:[%s197_s2] ss:$0 sm:$0xff] }
   0xf   :  { %62 = vmatpush.msra.mxu0 %v53_v4 }
  0x11   :  { %63 = vmatpush.msra.mxu0 %v52_v5 }
  0x13   :  { %64 = vmatpush.msra.mxu0 %v51_v6 }
  0x15   :  { %65 = vmatpush.msra.mxu0 %v50_v7 }
  0x17   :  { %66 = vmatpush.msra.mxu0 %v49_v8 }
  0x19   :  { %67 = vmatpush.msra.mxu0 %v48_v9 }
  0x1b   :  { %68 = vmatpush.msra.mxu0 %v47_v10 }
  0x1d   :  { %69 = vmatpush.msra.mxu0 %v46_v11 }
  0x1f   :  { %70 = vmatpush.msra.mxu0 %v45_v12 }
  0x21   :  { %71 = vmatpush.msra.mxu0 %v44_v13 }
  0x23   :  { %72 = vmatpush.msra.mxu0 %v43_v14 }
  0x25   :  { %73 = vmatpush.msra.mxu0 %v42_v15 }
  0x26   :  { %74 = vmatmul.f32.vlgmr.msra.gmra.mxu0 %v41_v16 }
  0xa3   :  { %v75_v18 = vpop.f32.mrf.mxu0 }
  0xa4   :  { %v78_v19 = vadd.f32 %v106_v17, %v75_v18 }
  0xa6   :  { %84 = vst [vmem:[#allocation6] sm:$0xff] %v78_v19 }
  0xa7   :  { %95 = dma.vmem_to_hbm [thread:$0]  %s91_s23, 128, %s93_s26, [#allocation5]  }
  0xa8   :  { %157 = dma.done.wait [#allocation5], 128  }
  0xa9   :  { %158 = vsyncadd [#allocation5], 4294967168 }
  0xaa   :  { %100 = vsyncpa [#allocation4], 1 }
  0xab   :  { %101 = vsyncpa [#allocation5], 1 }

</bundles_post_ra>
